<compile_context>
chip_gen: v7x
topology: tpu7x:2x2x1
jax: 0.10.0
libtpu: 0.0.40
codegen_flags: <defaults>
</compile_context>

<pallas_src>
import functools

import jax
import jax.numpy as jnp
from jax.experimental import pallas as pl
from jax.experimental.pallas import tpu as pltpu


def _sinkhorn_kernel(feat_ref, head_ref, out_ref, *, num_iters, epsilon,
                     n_valid, k_valid):
    f = feat_ref[...].astype(jnp.float32)   # (Np, D)  raw features (maybe padded)
    h = head_ref[...].astype(jnp.float32)   # (D, Kp)  raw head     (maybe padded)
    n_p, _ = f.shape
    k_p = h.shape[1]

    # torch.nn.functional.normalize(x, dim=1): x / max(||x||_2, 1e-12).
    #   head norms (over dim=1 of (D,K)) depend on the contraction index d
    #     -> applied as one broadcast multiply on h before the matmul;
    #   feature row norms commute with the matmul
    #     -> folded into the exp argument together with 1/epsilon.
    # 1/max(sqrt(s), 1e-12) == rsqrt(max(s, 1e-24)) for s >= 0 (single EUP op).
    inv_nf = jax.lax.rsqrt(
        jnp.maximum(jnp.sum(f * f, axis=1, keepdims=True), 1e-24))  # (Np, 1)
    inv_nh = jax.lax.rsqrt(
        jnp.maximum(jnp.sum(h * h, axis=1, keepdims=True), 1e-24))  # (D, 1)

    logits = jnp.dot(f, h * inv_nh, preferred_element_type=jnp.float32)  # MXU
    z = logits * (inv_nf * (1.0 / epsilon))   # == (f_hat @ h_hat) / epsilon

    # Global-max subtraction: a global scale of P0 cancels exactly through the
    # Sinkhorn normalisation but keeps exp() inside the f32 range.
    z = z - jnp.max(z)
    p0 = jnp.exp(z)                           # (Np, Kp), EUP

    # Zero out padded rows / columns so they never contribute to any sum
    # (exact zeros are required: tiny residuals would blow up through the
    # reciprocals of the padded column sums).
    need_row_mask = n_valid < n_p
    need_col_mask = k_valid < k_p
    if need_row_mask or need_col_mask:
        mask = None
        if need_row_mask:
            rows = jax.lax.broadcasted_iota(jnp.int32, (n_p, k_p), 0)
            mask = rows < n_valid
        if need_col_mask:
            cols = jax.lax.broadcasted_iota(jnp.int32, (n_p, k_p), 1)
            cmask = cols < k_valid
            mask = cmask if mask is None else (mask & cmask)
        p0 = jnp.where(mask, p0, 0.0)

    b_const = float(n_valid)   # B in the reference (samples incl. queue)
    k_const = float(k_valid)   # K in the reference (number of prototypes)

    if num_iters <= 0:
        # Degenerate reference path: Q /= sum(Q); Q *= B.
        s_tot = jnp.sum(p0)
        scale = jnp.where(s_tot > 0.0, b_const / s_tot, 0.0)
        out_ref[...] = (p0 * scale).astype(out_ref.dtype)
        return

    # Sinkhorn with scaling vectors: P_t = u * P0 * v.  Each half-iteration of
    # the reference ("divide by axis sum, then by K or B") collapses to
    #     v_k = 1 / (K * sum_n u_n P0[n,k])    u_n = 1 / (B * sum_k P0[n,k] v_k)
    # because the previous v (resp. u) cancels inside the sum it normalises,
    # and the initial global normalisation is absorbed by the first step.
    u = jnp.ones((n_p, 1), jnp.float32)
    v = None
    for _ in range(num_iters):      # short static trip-count -> unrolled
        col = jnp.sum(p0 * u, axis=0, keepdims=True)                   # (1, Kp)
        v = jnp.where(col > 0.0, pl.reciprocal(k_const * col), 0.0)    # (1, Kp)
        row = jnp.sum(p0 * v, axis=1, keepdims=True)                   # (Np, 1)
        u = jnp.where(row > 0.0, pl.reciprocal(b_const * row), 0.0)    # (Np, 1)

    # Final Q *= B; the (N, K) result is materialised exactly once here.
    out = (b_const * u) * p0 * v
    out_ref[...] = out.astype(out_ref.dtype)


def _round_up(x, m):
    return ((x + m - 1) // m) * m


def sinkhorn_knopp(features, head, queue=None, *, num_iters=3, epsilon=0.05):
    """JAX wrapper reproducing SinkhornKnopp.forward semantics.

    features: (N, D) float array (any float dtype; cast to f32 in-kernel)
    head:     (D, K) float array
    queue:    optional (Nq, D) float array appended below features
    returns:  (N, K) float32 assignments (queue rows dropped, as in reference)
    """
    n_keep = features.shape[0]
    if queue is not None and queue.shape[0] > 0:
        features = jnp.concatenate([features, queue], axis=0)

    n, d = features.shape
    dh, k = head.shape
    assert d == dh, "features/head contraction dims must match"

    # Lane-dense padding: K (output lane dim) -> multiple of 128, N (sublane
    # dim) -> multiple of 8.  Padded rows/cols are masked in-kernel and sliced
    # off below.
    n_pad = _round_up(n, 8)
    k_pad = _round_up(k, 128)
    if n_pad != n:
        features = jnp.pad(features, ((0, n_pad - n), (0, 0)))
    if k_pad != k:
        head = jnp.pad(head, ((0, 0), (0, k_pad - k)))

    kernel = functools.partial(
        _sinkhorn_kernel,
        num_iters=num_iters,
        epsilon=epsilon,
        n_valid=n,
        k_valid=k,
    )

    # VMEM budget: double-buffered inputs/output plus ~6 (N,K)-sized f32
    # intermediates (z, p0, products); never below the 32 MiB default, never
    # above ~90% of the chip's physical per-core VMEM.
    need = 4 * (2 * n_pad * d + 2 * d * k_pad + 8 * n_pad * k_pad)
    vmem_limit = int(min(max(need, 32 * 1024 * 1024), 128 * 1024 * 1024))
    try:
        cap = pltpu.get_tpu_info().vmem_capacity_bytes
        vmem_limit = int(min(vmem_limit, int(cap * 0.9)))
    except Exception:
        vmem_limit = int(min(vmem_limit, 64 * 1024 * 1024))

    out = pl.pallas_call(
        kernel,
        out_shape=jax.ShapeDtypeStruct((n_pad, k_pad), jnp.float32),
        grid=(1,),
        in_specs=[
            pl.BlockSpec((n_pad, d), lambda i: (0, 0)),
            pl.BlockSpec((d, k_pad), lambda i: (0, 0)),
        ],
        out_specs=pl.BlockSpec((n_pad, k_pad), lambda i: (0, 0)),
        compiler_params=pltpu.CompilerParams(
            dimension_semantics=("arbitrary",),
            vmem_limit_bytes=vmem_limit,
        ),
    )(features, head)

    return out[:n_keep, :k]


def _sinkhorn_reference(features, head, queue, *, num_iters=3, epsilon=0.05):
    """Straight jnp port of the PyTorch module (f32 instead of f64)."""
    n_keep = features.shape[0]
    if queue is not None and queue.shape[0] > 0:
        features = jnp.concatenate([features, queue], axis=0)
    f = features / jnp.maximum(
        jnp.linalg.norm(features, axis=1, keepdims=True), 1e-12)
    h = head / jnp.maximum(jnp.linalg.norm(head, axis=1, keepdims=True), 1e-12)
    q = jnp.exp((f @ h) / epsilon).T
    b = q.shape[1]
    kk = q.shape[0]
    q = q / jnp.sum(q)
    for _ in range(num_iters):
        q = q / jnp.sum(q, axis=1, keepdims=True)
        q = q / kk
        q = q / jnp.sum(q, axis=0, keepdims=True)
        q = q / b
    q = q * b
    return q.T[:n_keep]


if __name__ == "__main__":
    key = jax.random.PRNGKey(0)
    k_f, k_h, k_q = jax.random.split(key, 3)

    N, D, K = 8, 32, 16
    features = jax.random.normal(k_f, (N, D), dtype=jnp.float32)
    head = jax.random.normal(k_h, (D, K), dtype=jnp.float32)
    queue = jax.random.normal(k_q, (4, D), dtype=jnp.float32)

    # no-queue path
    q1 = jax.block_until_ready(sinkhorn_knopp(features, head, queue=None))
    assert q1.shape == (N, K)
    assert bool(jnp.all(jnp.isfinite(q1)))
    ref1 = _sinkhorn_reference(features, head, None)
    err1 = float(jnp.max(jnp.abs(q1 - ref1)) / (jnp.max(jnp.abs(ref1)) + 1e-12))
    assert err1 < 1e-2, f"no-queue mismatch vs reference: {err1}"

    # queue path (queue rows are dropped from the returned assignments)
    q2 = jax.block_until_ready(sinkhorn_knopp(features, head, queue=queue))
    assert q2.shape == (N, K)
    assert bool(jnp.all(jnp.isfinite(q2)))
    ref2 = _sinkhorn_reference(features, head, queue)
    err2 = float(jnp.max(jnp.abs(q2 - ref2)) / (jnp.max(jnp.abs(ref2)) + 1e-12))
    assert err2 < 1e-2, f"queue mismatch vs reference: {err2}"

    print("KERNEL_OK")
</pallas_src>

<mosaic_0001>
module attributes {stable_mosaic.version = 11 : i64} {
  func.func @_sinkhorn_kernel(%arg0: i32, %arg1: memref<8x32xf32, #tpu.memory_space<vmem>>, %arg2: memref<32x128xf32, #tpu.memory_space<vmem>>, %arg3: memref<8x128xf32, #tpu.memory_space<vmem>>) attributes {dimension_semantics = [#tpu.dimension_semantics<arbitrary>], iteration_bounds = array<i64: 1>, scalar_prefetch = 0 : i64, scratch_operands = 0 : i64, tpu.core_type = #tpu.core_type<tc>, window_params = [{pipeline_mode = #tpu.pipeline_mode<synchronous>, transform_indices = @transform_0, window_bounds = array<i64: 8, 32>}, {pipeline_mode = #tpu.pipeline_mode<synchronous>, transform_indices = @transform_1, window_bounds = array<i64: 32, 128>}, {pipeline_mode = #tpu.pipeline_mode<synchronous>, transform_indices = @transform_2, window_bounds = array<i64: 8, 128>}]} {
    %c0 = arith.constant 0 : index
    %c0_0 = arith.constant 0 : index
    %0 = vector.load %arg1[%c0, %c0_0] : memref<8x32xf32, #tpu.memory_space<vmem>>, vector<8x32xf32>
    %c0_1 = arith.constant 0 : index
    %c0_2 = arith.constant 0 : index
    %1 = vector.load %arg2[%c0_1, %c0_2] : memref<32x128xf32, #tpu.memory_space<vmem>>, vector<32x128xf32>
    %2 = arith.mulf %0, %0 : vector<8x32xf32>
    %cst = arith.constant dense<0.000000e+00> : vector<8xf32>
    %3 = vector.multi_reduction <add>, %2, %cst [1] : vector<8x32xf32> to vector<8xf32>
    %4 = vector.shape_cast %3 : vector<8xf32> to vector<8x1xf32>
    %cst_3 = arith.constant 1.000000e-24 : f32
    %5 = vector.broadcast %cst_3 : f32 to vector<8x1xf32>
    %6 = arith.maximumf %4, %5 : vector<8x1xf32>
    %7 = math.rsqrt %6 : vector<8x1xf32>
    %8 = arith.mulf %1, %1 : vector<32x128xf32>
    %cst_4 = arith.constant dense<0.000000e+00> : vector<32xf32>
    %9 = vector.multi_reduction <add>, %8, %cst_4 [1] : vector<32x128xf32> to vector<32xf32>
    %10 = vector.shape_cast %9 : vector<32xf32> to vector<32x1xf32>
    %cst_5 = arith.constant 1.000000e-24 : f32
    %11 = vector.broadcast %cst_5 : f32 to vector<32x1xf32>
    %12 = arith.maximumf %10, %11 : vector<32x1xf32>
    %13 = math.rsqrt %12 : vector<32x1xf32>
    %14 = vector.broadcast %13 : vector<32x1xf32> to vector<32x128xf32>
    %15 = arith.mulf %1, %14 : vector<32x128xf32>
    %cst_6 = arith.constant dense<0.000000e+00> : vector<8x128xf32>
    %16 = tpu.matmul %0, %15, %cst_6 {dimension_numbers = #tpu.dot_dimension_numbers<[1], [0], [0], [1], [0, 0, 1, 1], [], []>} : vector<8x32xf32>, vector<32x128xf32>, vector<8x128xf32> -> vector<8x128xf32>
    %cst_7 = arith.constant 2.000000e+01 : f32
    %17 = vector.broadcast %cst_7 : f32 to vector<8x1xf32>
    %18 = arith.mulf %7, %17 : vector<8x1xf32>
    %19 = vector.broadcast %18 : vector<8x1xf32> to vector<8x128xf32>
    %20 = arith.mulf %16, %19 : vector<8x128xf32>
    %21 = vector.shape_cast %20 : vector<8x128xf32> to vector<1x8x128xf32>
    %cst_8 = arith.constant dense<0xFF800000> : vector<1xf32>
    %22 = vector.multi_reduction <maximumf>, %21, %cst_8 [1, 2] : vector<1x8x128xf32> to vector<1xf32>
    %23 = vector.shape_cast %22 : vector<1xf32> to vector<1x1x1xf32>
    %24 = vector.extract %23[0, 0, 0] : f32 from vector<1x1x1xf32>
    %25 = vector.broadcast %24 : f32 to vector<8x128xf32>
    %26 = arith.subf %20, %25 : vector<8x128xf32>
    %27 = math.exp %26 : vector<8x128xf32>
    %28 = tpu.iota {dimensions = array<i32: 1>} : vector<8x128xi32>
    %c16_i32 = arith.constant 16 : i32
    %29 = vector.broadcast %c16_i32 : i32 to vector<8x128xi32>
    %30 = arith.cmpi slt, %28, %29 : vector<8x128xi32>
    %cst_9 = arith.constant 0.000000e+00 : f32
    %31 = vector.broadcast %cst_9 : f32 to vector<8x128xf32>
    %32 = arith.select %30, %27, %31 : vector<8x128xi1>, vector<8x128xf32>
    %cst_10 = arith.constant 1.000000e+00 : f32
    %33 = vector.broadcast %cst_10 : f32 to vector<8x1xf32>
    %34 = vector.broadcast %33 : vector<8x1xf32> to vector<8x128xf32>
    %35 = arith.mulf %32, %34 : vector<8x128xf32>
    %cst_11 = arith.constant dense<0.000000e+00> : vector<128xf32>
    %36 = vector.multi_reduction <add>, %35, %cst_11 [0] : vector<8x128xf32> to vector<128xf32>
    %37 = vector.shape_cast %36 : vector<128xf32> to vector<1x128xf32>
    %cst_12 = arith.constant 0.000000e+00 : f32
    %38 = vector.broadcast %cst_12 : f32 to vector<1x128xf32>
    %39 = arith.cmpf ogt, %37, %38 : vector<1x128xf32>
    %cst_13 = arith.constant 1.600000e+01 : f32
    %40 = vector.broadcast %cst_13 : f32 to vector<1x128xf32>
    %41 = arith.mulf %40, %37 : vector<1x128xf32>
    %42 = tpu.reciprocal %41 : vector<1x128xf32> -> vector<1x128xf32>
    %cst_14 = arith.constant 0.000000e+00 : f32
    %43 = vector.broadcast %cst_14 : f32 to vector<1x128xf32>
    %44 = arith.select %39, %42, %43 : vector<1x128xi1>, vector<1x128xf32>
    %45 = vector.broadcast %44 : vector<1x128xf32> to vector<8x128xf32>
    %46 = arith.mulf %32, %45 : vector<8x128xf32>
    %cst_15 = arith.constant dense<0.000000e+00> : vector<8xf32>
    %47 = vector.multi_reduction <add>, %46, %cst_15 [1] : vector<8x128xf32> to vector<8xf32>
    %48 = vector.shape_cast %47 : vector<8xf32> to vector<8x1xf32>
    %cst_16 = arith.constant 0.000000e+00 : f32
    %49 = vector.broadcast %cst_16 : f32 to vector<8x1xf32>
    %50 = arith.cmpf ogt, %48, %49 : vector<8x1xf32>
    %cst_17 = arith.constant 8.000000e+00 : f32
    %51 = vector.broadcast %cst_17 : f32 to vector<8x1xf32>
    %52 = arith.mulf %51, %48 : vector<8x1xf32>
    %53 = tpu.reciprocal %52 : vector<8x1xf32> -> vector<8x1xf32>
    %cst_18 = arith.constant 0.000000e+00 : f32
    %54 = vector.broadcast %cst_18 : f32 to vector<8x1xf32>
    %55 = arith.select %50, %53, %54 : vector<8x1xi1>, vector<8x1xf32>
    %56 = vector.broadcast %55 : vector<8x1xf32> to vector<8x128xf32>
    %57 = arith.mulf %32, %56 : vector<8x128xf32>
    %cst_19 = arith.constant dense<0.000000e+00> : vector<128xf32>
    %58 = vector.multi_reduction <add>, %57, %cst_19 [0] : vector<8x128xf32> to vector<128xf32>
    %59 = vector.shape_cast %58 : vector<128xf32> to vector<1x128xf32>
    %cst_20 = arith.constant 0.000000e+00 : f32
    %60 = vector.broadcast %cst_20 : f32 to vector<1x128xf32>
    %61 = arith.cmpf ogt, %59, %60 : vector<1x128xf32>
    %cst_21 = arith.constant 1.600000e+01 : f32
    %62 = vector.broadcast %cst_21 : f32 to vector<1x128xf32>
    %63 = arith.mulf %62, %59 : vector<1x128xf32>
    %64 = tpu.reciprocal %63 : vector<1x128xf32> -> vector<1x128xf32>
    %cst_22 = arith.constant 0.000000e+00 : f32
    %65 = vector.broadcast %cst_22 : f32 to vector<1x128xf32>
    %66 = arith.select %61, %64, %65 : vector<1x128xi1>, vector<1x128xf32>
    %67 = vector.broadcast %66 : vector<1x128xf32> to vector<8x128xf32>
    %68 = arith.mulf %32, %67 : vector<8x128xf32>
    %cst_23 = arith.constant dense<0.000000e+00> : vector<8xf32>
    %69 = vector.multi_reduction <add>, %68, %cst_23 [1] : vector<8x128xf32> to vector<8xf32>
    %70 = vector.shape_cast %69 : vector<8xf32> to vector<8x1xf32>
    %cst_24 = arith.constant 0.000000e+00 : f32
    %71 = vector.broadcast %cst_24 : f32 to vector<8x1xf32>
    %72 = arith.cmpf ogt, %70, %71 : vector<8x1xf32>
    %cst_25 = arith.constant 8.000000e+00 : f32
    %73 = vector.broadcast %cst_25 : f32 to vector<8x1xf32>
    %74 = arith.mulf %73, %70 : vector<8x1xf32>
    %75 = tpu.reciprocal %74 : vector<8x1xf32> -> vector<8x1xf32>
    %cst_26 = arith.constant 0.000000e+00 : f32
    %76 = vector.broadcast %cst_26 : f32 to vector<8x1xf32>
    %77 = arith.select %72, %75, %76 : vector<8x1xi1>, vector<8x1xf32>
    %78 = vector.broadcast %77 : vector<8x1xf32> to vector<8x128xf32>
    %79 = arith.mulf %32, %78 : vector<8x128xf32>
    %cst_27 = arith.constant dense<0.000000e+00> : vector<128xf32>
    %80 = vector.multi_reduction <add>, %79, %cst_27 [0] : vector<8x128xf32> to vector<128xf32>
    %81 = vector.shape_cast %80 : vector<128xf32> to vector<1x128xf32>
    %cst_28 = arith.constant 0.000000e+00 : f32
    %82 = vector.broadcast %cst_28 : f32 to vector<1x128xf32>
    %83 = arith.cmpf ogt, %81, %82 : vector<1x128xf32>
    %cst_29 = arith.constant 1.600000e+01 : f32
    %84 = vector.broadcast %cst_29 : f32 to vector<1x128xf32>
    %85 = arith.mulf %84, %81 : vector<1x128xf32>
    %86 = tpu.reciprocal %85 : vector<1x128xf32> -> vector<1x128xf32>
    %cst_30 = arith.constant 0.000000e+00 : f32
    %87 = vector.broadcast %cst_30 : f32 to vector<1x128xf32>
    %88 = arith.select %83, %86, %87 : vector<1x128xi1>, vector<1x128xf32>
    %89 = vector.broadcast %88 : vector<1x128xf32> to vector<8x128xf32>
    %90 = arith.mulf %32, %89 : vector<8x128xf32>
    %cst_31 = arith.constant dense<0.000000e+00> : vector<8xf32>
    %91 = vector.multi_reduction <add>, %90, %cst_31 [1] : vector<8x128xf32> to vector<8xf32>
    %92 = vector.shape_cast %91 : vector<8xf32> to vector<8x1xf32>
    %cst_32 = arith.constant 0.000000e+00 : f32
    %93 = vector.broadcast %cst_32 : f32 to vector<8x1xf32>
    %94 = arith.cmpf ogt, %92, %93 : vector<8x1xf32>
    %cst_33 = arith.constant 8.000000e+00 : f32
    %95 = vector.broadcast %cst_33 : f32 to vector<8x1xf32>
    %96 = arith.mulf %95, %92 : vector<8x1xf32>
    %97 = tpu.reciprocal %96 : vector<8x1xf32> -> vector<8x1xf32>
    %cst_34 = arith.constant 0.000000e+00 : f32
    %98 = vector.broadcast %cst_34 : f32 to vector<8x1xf32>
    %99 = arith.select %94, %97, %98 : vector<8x1xi1>, vector<8x1xf32>
    %cst_35 = arith.constant 8.000000e+00 : f32
    %100 = vector.broadcast %cst_35 : f32 to vector<8x1xf32>
    %101 = arith.mulf %100, %99 : vector<8x1xf32>
    %102 = vector.broadcast %101 : vector<8x1xf32> to vector<8x128xf32>
    %103 = arith.mulf %102, %32 : vector<8x128xf32>
    %104 = vector.broadcast %88 : vector<1x128xf32> to vector<8x128xf32>
    %105 = arith.mulf %103, %104 : vector<8x128xf32>
    %c0_36 = arith.constant 0 : index
    %c0_37 = arith.constant 0 : index
    %106 = vector.load %arg3[%c0_36, %c0_37] : memref<8x128xf32, #tpu.memory_space<vmem>>, vector<8x128xf32>
    tpu.vector_store %arg3[%c0_36, %c0_37], %105 {strides = array<i32>} : memref<8x128xf32, #tpu.memory_space<vmem>>, vector<8x128xf32>,
    return
  }
  func.func @transform_0(%arg0: i32) -> (i32, i32) {
    %c0_i32 = arith.constant 0 : i32
    %c0_i32_0 = arith.constant 0 : i32
    %c0_i32_1 = arith.constant 0 : i32
    return %c0_i32, %c0_i32_0 : i32, i32
  }
  func.func @transform_1(%arg0: i32) -> (i32, i32) {
    %c0_i32 = arith.constant 0 : i32
    %c0_i32_0 = arith.constant 0 : i32
    %c0_i32_1 = arith.constant 0 : i32
    return %c0_i32, %c0_i32_0 : i32, i32
  }
  func.func @transform_2(%arg0: i32) -> (i32, i32) {
    %c0_i32 = arith.constant 0 : i32
    %c0_i32_0 = arith.constant 0 : i32
    %c0_i32_1 = arith.constant 0 : i32
    return %c0_i32, %c0_i32_0 : i32, i32
  }
}

</mosaic_0001>

<bundles_post_ra>
// kernel: tpu_custom_call.1
= control target key start
LH: loop header
LB: loop body
LE: loop exit
PB: predicated region body
PF: predicated region fallthrough
CT: control target
= control target key end

     0   :  { %7 = vsyncpa [#allocation3], 0  ;;  %s446_s0 = inlined_call_operand.hbm [shape: f32[8,32], index: 0, kind: input, shape index: {}]   ;;  %s447_s1 = inlined_call_operand.hbm [shape: f32[32,128], index: 1, kind: input, shape index: {}]   ;;  %s448_s2 = inlined_call_operand.hbm [shape: f32[8,128], index: 2, kind: output, shape index: {}]  }
   0x1   :  { %8 = vsyncpa [#allocation6], 0 }
   0x2   :  { %9 = vsyncpa [#allocation4], 0  ;;  %s368_s9 = smov [#allocation2]   ;;  %s369_s11 = smov [#allocation5]  }
   0x3   :  { %s16_s10 = sshll.u32 %s368_s9, 4  ;;  %s25_s12 = sshll.u32 %s369_s11, 4  ;;  %s17_s10 = int_to_ptr.vmem [resolvable:$true] %s16_s10  ;;  %s391_s12 = int_to_ptr.vmem [resolvable:$true] %s25_s12 }
   0x4   :  { %s296_s15 = scalar_lea.hbm %s446_s0, 128 }
   0x5   :  { %p297_p0 = scmp.ne.s32.totalorder %s446_s0, %s296_s15  ;;  %p300_p1 = scmp.lt.u32.totalorder %s296_s15, %s446_s0 }
   0x7   :  { %p302_p2 = pnand %p300_p1, %p297_p0 }
   0x9   :  { %305 = shalt.err (!%p302_p2)
}
   0xa   :  { %s306_s20 = scalar_lea.vmem %s17_s10, 128  ;;  %p311_p4 = scmp.lt.s32.totalorder %s17_s10, %s17_s10 }
   0xb   :  { %p307_p3 = scmp.ne.s32.totalorder %s17_s10, %s306_s20  ;;  %p312_p5 = scmp.lt.s32.totalorder %s306_s20, %s306_s20 }
   0xd   :  { %p313_p6 = por %p312_p5, %p311_p4 }
   0xf   :  { %p314_p7 = pnand %p313_p6, %p307_p3 }
  0x11   :  { %317 = shalt.err (!%p314_p7)
}
  0x12   :  { %19 = dma.hbm_to_vmem [thread:$0]  %s446_s0, 128, %s17_s10, [#allocation3]  }
  0x13   :  { %s318_s25 = scalar_lea.hbm %s447_s1, 512 }
  0x14   :  { %p319_p8 = scmp.ne.s32.totalorder %s447_s1, %s318_s25  ;;  %p322_p9 = scmp.lt.u32.totalorder %s318_s25, %s447_s1 }
  0x16   :  { %p324_p10 = pnand %p322_p9, %p319_p8 }
  0x18   :  { %327 = shalt.err (!%p324_p10)
}
  0x19   :  { %s328_s30 = scalar_lea.vmem %s391_s12, 512  ;;  %p333_p12 = scmp.lt.s32.totalorder %s391_s12, %s391_s12 }
  0x1a   :  { %p329_p11 = scmp.ne.s32.totalorder %s391_s12, %s328_s30  ;;  %p334_p13 = scmp.lt.s32.totalorder %s328_s30, %s328_s30 }
  0x1c   :  { %p335_p0 = por %p334_p13, %p333_p12 }
  0x1e   :  { %p336_p1 = pnand %p335_p0, %p329_p11 }
  0x20   :  { %339 = shalt.err (!%p336_p1)
}
  0x21   :  { %s370_s0 = smov 128   ;;  %s371_s3 = smov 8  }
  0x22   :  { %31 = dma.hbm_to_vmem [thread:$0]  %s447_s1, 512, %s391_s12, [#allocation6], %s370_s0, %s370_s0, %s371_s3  }
  0x23   :  { %362 = dma.done.wait [#allocation3], 128  }
  0x24   :  { %363 = vsyncadd [#allocation3], 4294967168 }
  0x25   :  { %364 = dma.done.wait [#allocation6], 512  }
  0x26   :  { %365 = vsyncadd [#allocation6], 4294966784  ;;  %v41_v0 = vld [vmem:[#allocation5 + $0x10] sm:$0xff]  ;;  %v39_v1 = vld [vmem:[#allocation5] sm:$0xff]  ;;  %v372_v8 = vmov 0.0|0.0   ;;  %vm373_vm0 = vmmov 0   ;;  %v162_v48 = vlaneseq }
  0x27   :  { %v42_v2 = vld [vmem:[#allocation5 + $0x18] sm:$0xff]  ;;  %v52_v3 = vmul.f32 %v41_v0, %v41_v0  ;;  %v50_v4 = vmul.f32 %v39_v1, %v39_v1  ;;  %v40_v5 = vld [vmem:[#allocation5 + $0x8] sm:$0xff]  ;;  %256 = vmatprep.subr.bf16.mxu0 %v372_v8  ;;  %v374_v9 = vmov 0.0   ;;  %vm44_vm1 = vcmask 261120   ;;  %s375_s6 = smov [#allocation7]  }
  0x28   :  { %v53_v6 = vmul.f32 %v42_v2, %v42_v2  ;;  %v51_v7 = vmul.f32 %v40_v5, %v40_v5  ;;  %253 = vmatprep.mubr.msk.f32.mxu0 %vm373_vm0, %v374_v9  ;;  %v38_v10 = vld [vmem:[#allocation2] sm:$0xff]  ;;  %v163_v49 = vand.u32 127, %v162_v48  ;;  %s229_s7 = sshll.u32 %s375_s6, 4  ;;  %s230_s7 = int_to_ptr.vmem [resolvable:$true] %s229_s7 }
  0x29   :  { %58 = vadd.xlane.f32.xlu1 %v52_v3  ;;  %54 = vadd.xlane.f32.xlu0 %v50_v4  ;;  %v43_v11 = vmul.f32 %v38_v10, %v38_v10  ;;  %s340_s8 = scalar_lea.vmem %s230_s7, 128  ;;  %p345_p3 = scmp.lt.s32.totalorder %s230_s7, %s230_s7 }
  0x2a   :  { %vm164_vm2 = vcmp.lt.s32.totalorder %v163_v49, 16  ;;  %p341_p2 = scmp.ne.s32.totalorder %s230_s7, %s340_s8  ;;  %p346_p4 = scmp.lt.s32.totalorder %s340_s8, %s340_s8 }
  0x2b   :  { %v45_v12 = vsel %vm44_vm1, %v43_v11, 0.0 }
  0x2c   :  { %p347_p5 = por %p346_p4, %p345_p3 }
  0x2d   :  { %60 = vadd.xlane.f32.xlu1 %v53_v6  ;;  %56 = vadd.xlane.f32.xlu0 %v51_v7 }
  0x2e   :  { %p348_p6 = pnand %p347_p5, %p341_p2 }
  0x31   :  { %46 = vadd.xlane.f32.xlu0 %v45_v12 }
  0xb6   :  { %v59_v13 = vpop.xlane.xlu1 %58  ;;  %v55_v14 = vpop.xlane.xlu0 %54 }
  0xb7   :  { %v64_v15 = vmax.f32 %v59_v13, 1e-24  ;;  %v62_v16 = vmax.f32 %v55_v14, 1e-24 }
  0xb9   :  { %272 = vrsqrt.f32 %v64_v15 }
  0xba   :  { %v61_v17 = vpop.xlane.xlu1 %60  ;;  %v57_v18 = vpop.xlane.xlu0 %56  ;;  %274 = vrsqrt.f32 %v62_v16 }
  0xbb   :  { %v65_v19 = vmax.f32 %v61_v17, 1e-24  ;;  %v63_v20 = vmax.f32 %v57_v18, 1e-24 }
  0xbd   :  { %276 = vrsqrt.f32 %v65_v19 }
  0xbe   :  { %278 = vrsqrt.f32 %v63_v20  ;;  %v47_v31 = vpop.xlane.xlu0 %46 }
  0xbf   :  { %v48_v32 = vmax.f32 %v47_v31, 1e-24 }
  0xc1   :  { %280 = vrsqrt.f32 %v48_v32 }
  0xc3   :  { %v273_v21 = vpop.eup %272 }
  0xc4   :  { %v275_v22 = vpop.eup %274  ;;  %v72_v28 = vmul.f32 %v273_v21, %v41_v0 }
  0xc5   :  { %v70_v25 = vmul.f32 %v275_v22, %v39_v1 }
  0xc7   :  { %v277_v23 = vpop.eup %276 }
  0xc8   :  { %v279_v24 = vpop.eup %278  ;;  %v73_v29 = vmul.f32 %v277_v23, %v42_v2 }
  0xc9   :  { %v71_v26 = vmul.f32 %v279_v24, %v40_v5 }
  0xca   :  { %v260_v30 = vpack.c.bf16 %v73_v29, %v72_v28 }
  0xcb   :  { %v257_v27 = vpack.c.bf16 %v71_v26, %v70_v25  ;;  %v281_v33 = vpop.eup %280 }
  0xcc   :  { %v147_v34 = vmul.f32 20.0, %v281_v33 }
  0xcd   :  { %258 = vmatpush3.bf16.msra.mxu0 %v257_v27 }
  0xce   :  { %259 = vmatprep.subr.bf16.mxu0 %v372_v8 }
  0xd1   :  { %261 = vmatpush3.bf16.msra.mxu0 %v260_v30 }
  0xd4   :  { %254 = vmatmul.mubr.msk.f32.vlgmr.msra.gmra.mrb[0].mxu0 %vm44_vm1, %v38_v10 }
 0x1a7   :  { %v143_v35 = vpop.f32.mrb[0].mxu0 }
 0x1a8   :  { %v148_v36 = vmul.f32 %v147_v34, %v143_v35  ;;  %v255_v37 = vpop.f32.mrb[1].mxu0 }
 0x1aa   :  { %149 = vmax.xlane.f32.xlu1 %v148_v36 }
 0x237   :  { %v150_v38 = vpop.xlane.xlu1 %149 }
 0x238   :  { %v151_v39 = vrot.slane %v150_v38, 4 }
 0x23a   :  { %v152_v40 = vmax.f32 %v150_v38, %v151_v39 }
 0x23c   :  { %v153_v41 = vrot.slane %v152_v40, 2 }
 0x23e   :  { %v154_v42 = vmax.f32 %v152_v40, %v153_v41 }
 0x240   :  { %v155_v43 = vrot.slane %v154_v42, 1 }
 0x242   :  { %v156_v44 = vmax.f32 %v154_v42, %v155_v43 }
 0x244   :  { %262 = vpush %v156_v44 }
 0x275   :  { %s263_s1 = spop %262 }
 0x276   :  { %v158_v45 = vstv %s263_s1 }
 0x277   :  { %v159_v46 = vsub.f32 %v148_v36, %v158_v45 }
 0x279   :  { %v160_v47 = vmul.f32 1.442695, %v159_v46 }
 0x27b   :  { %282 = vpow2.f32 %v160_v47 }
 0x285   :  { %v283_v50 = vpop.eup %282 }
 0x286   :  { %v424_v51 = vsel %vm164_vm2, %v283_v50, 0.0 }
 0x287   :  { %v166_v52 = vrot.slane %v424_v51, 4 }
 0x289   :  { %v167_v53 = vadd.f32 %v166_v52, %v424_v51 }
 0x28b   :  { %v168_v54 = vrot.slane %v167_v53, 2 }
 0x28d   :  { %v169_v55 = vadd.f32 %v168_v54, %v167_v53 }
 0x28f   :  { %v170_v56 = vrot.slane %v169_v55, 1 }
 0x291   :  { %v171_v57 = vadd.f32 %v170_v56, %v169_v55 }
 0x293   :  { %v173_v58 = vmul.f32 16.0, %v171_v57  ;;  %vm172_vm3 = vcmp.gt.f32.partialorder %v171_v57, 0.0 }
 0x295   :  { %284 = vrcp.f32 %v173_v58 }
 0x29f   :  { %v285_v59 = vpop.eup %284 }
 0x2a0   :  { %v175_v60 = vsel %vm172_vm3, %v285_v59, 0.0 }
 0x2a1   :  { %v176_v61 = vmul.f32 %v175_v60, %v424_v51 }
 0x2a3   :  { %177 = vadd.xlane.f32.xlu0 %v176_v61 }
 0x330   :  { %v178_v62 = vpop.xlane.xlu0 %177 }
 0x331   :  { %v180_v63 = vmul.f32 8.0, %v178_v62  ;;  %vm179_vm4 = vcmp.gt.f32.partialorder %v178_v62, 0.0 }
 0x333   :  { %286 = vrcp.f32 %v180_v63 }
 0x33d   :  { %v287_v0 = vpop.eup %286 }
 0x33e   :  { %v182_v1 = vsel %vm179_vm4, %v287_v0, 0.0 }
 0x33f   :  { %v183_v2 = vmul.f32 %v182_v1, %v424_v51 }
 0x341   :  { %v184_v3 = vrot.slane %v183_v2, 4 }
 0x343   :  { %v185_v4 = vadd.f32 %v184_v3, %v183_v2 }
 0x345   :  { %v186_v5 = vrot.slane %v185_v4, 2 }
 0x347   :  { %v187_v6 = vadd.f32 %v186_v5, %v185_v4 }
 0x349   :  { %v188_v7 = vrot.slane %v187_v6, 1 }
 0x34b   :  { %v189_v8 = vadd.f32 %v188_v7, %v187_v6 }
 0x34d   :  { %v191_v9 = vmul.f32 16.0, %v189_v8  ;;  %vm190_vm5 = vcmp.gt.f32.partialorder %v189_v8, 0.0 }
 0x34f   :  { %288 = vrcp.f32 %v191_v9 }
 0x359   :  { %v289_v10 = vpop.eup %288 }
 0x35a   :  { %v193_v11 = vsel %vm190_vm5, %v289_v10, 0.0 }
 0x35b   :  { %v194_v12 = vmul.f32 %v193_v11, %v424_v51 }
 0x35d   :  { %195 = vadd.xlane.f32.xlu1 %v194_v12 }
 0x3ea   :  { %v196_v13 = vpop.xlane.xlu1 %195 }
 0x3eb   :  { %v198_v14 = vmul.f32 8.0, %v196_v13  ;;  %vm197_vm6 = vcmp.gt.f32.partialorder %v196_v13, 0.0 }
 0x3ed   :  { %290 = vrcp.f32 %v198_v14 }
 0x3f7   :  { %v291_v15 = vpop.eup %290 }
 0x3f8   :  { %v200_v16 = vsel %vm197_vm6, %v291_v15, 0.0 }
 0x3f9   :  { %v201_v17 = vmul.f32 %v200_v16, %v424_v51 }
 0x3fb   :  { %v202_v18 = vrot.slane %v201_v17, 4 }
 0x3fd   :  { %v203_v19 = vadd.f32 %v202_v18, %v201_v17 }
 0x3ff   :  { %v204_v20 = vrot.slane %v203_v19, 2 }
 0x401   :  { %v205_v21 = vadd.f32 %v204_v20, %v203_v19 }
 0x403   :  { %v206_v22 = vrot.slane %v205_v21, 1 }
 0x405   :  { %v207_v23 = vadd.f32 %v206_v22, %v205_v21 }
 0x407   :  { %v209_v24 = vmul.f32 16.0, %v207_v23  ;;  %vm208_vm7 = vcmp.gt.f32.partialorder %v207_v23, 0.0 }
 0x409   :  { %292 = vrcp.f32 %v209_v24 }
 0x413   :  { %v293_v25 = vpop.eup %292 }
 0x414   :  { %v211_v26 = vsel %vm208_vm7, %v293_v25, 0.0 }
 0x415   :  { %v212_v27 = vmul.f32 %v211_v26, %v424_v51 }
 0x417   :  { %213 = vadd.xlane.f32.xlu0 %v212_v27 }
 0x4a4   :  { %v214_v28 = vpop.xlane.xlu0 %213 }
 0x4a5   :  { %v216_v29 = vmul.f32 8.0, %v214_v28  ;;  %vm215_vm8 = vcmp.gt.f32.partialorder %v214_v28, 0.0 }
 0x4a7   :  { %294 = vrcp.f32 %v216_v29 }
 0x4b1   :  { %v295_v30 = vpop.eup %294 }
 0x4b2   :  { %v218_v31 = vsel %vm215_vm8, %v295_v30, 0.0 }
 0x4b3   :  { %v219_v32 = vmul.f32 8.0, %v218_v31 }
 0x4b5   :  { %v220_v33 = vmul.f32 %v219_v32, %v424_v51 }
 0x4b7   :  { %v221_v34 = vmul.f32 %v220_v33, %v211_v26 }
 0x4b9   :  { %222 = vst [vmem:[#allocation7] sm:$0xff] %v221_v34 }
 0x4ba   :  { %351 = shalt.err (!%p348_p6)
}
 0x4bb   :  { %s352_s11 = scalar_lea.hbm %s448_s2, 128 }
 0x4bc   :  { %p353_p7 = scmp.ne.s32.totalorder %s448_s2, %s352_s11  ;;  %p356_p8 = scmp.lt.u32.totalorder %s352_s11, %s448_s2 }
 0x4be   :  { %p358_p9 = pnand %p356_p8, %p353_p7 }
 0x4c0   :  { %361 = shalt.err (!%p358_p9)
}
 0x4c1   :  { %232 = dma.vmem_to_hbm [thread:$0]  %s230_s7, 128, %s448_s2, [#allocation4]  }
 0x4c2   :  { %366 = dma.done.wait [#allocation4], 128  }
 0x4c3   :  { %367 = vsyncadd [#allocation4], 4294967168 }
 0x4c4   :  { %236 = vsyncpa [#allocation3], 1 }
 0x4c5   :  { %237 = vsyncpa [#allocation6], 1 }
 0x4c6   :  { %238 = vsyncpa [#allocation4], 1 }

</bundles_post_ra>
